<compile_context>
chip_gen: v7x
topology: tpu7x:2x2x1
jax: 0.10.0
libtpu: 0.0.40
codegen_flags: <defaults>
</compile_context>

<pallas_src>
import functools

import jax
import jax.numpy as jnp
from jax.experimental import pallas as pl
from jax.experimental.pallas import tpu as pltpu

_NEG_INF = -9e15


# --------------------------------------------------------------------------- #
# Kernel 1: fused multi-head projection  Wh = x @ W_h, f1 = Wh·a1, f2 = Wh·a2
# --------------------------------------------------------------------------- #
def _proj_kernel(x_ref, w_ref, a1_ref, a2_ref, wh_ref, f1_ref, f2_ref):
    nheads = w_ref.shape[0]
    x = x_ref[...]                       # [TM, Fin]  bf16
    a1 = a1_ref[...]                     # [H, Fout]  f32
    a2 = a2_ref[...]                     # [H, Fout]  f32

    f1_cols, f2_cols = [], []
    for h in range(nheads):              # static unroll over heads
        wh_h = jnp.dot(x, w_ref[h], preferred_element_type=jnp.float32)  # [TM, Fout] f32
        # attention score halves as VPU mul + XLU row-reduce (not 1-col MXU matmuls)
        f1_cols.append(jnp.sum(wh_h * a1[h:h + 1, :], axis=-1, keepdims=True))
        f2_cols.append(jnp.sum(wh_h * a2[h:h + 1, :], axis=-1, keepdims=True))
        wh_ref[h, :, :] = wh_h.astype(wh_ref.dtype)                      # bf16 store
    f1_ref[...] = jnp.concatenate(f1_cols, axis=1)   # [TM, H]  (dense store)
    f2_ref[...] = jnp.concatenate(f2_cols, axis=1)   # [TM, H]


# --------------------------------------------------------------------------- #
# Kernel 2: fused multi-head masked attention + softmax + att @ Wh (+ epilogue)
# --------------------------------------------------------------------------- #
def _attn_kernel(adj_ref, f1_ref, f2t_ref, wh_ref, out_ref, *,
                 alpha, apply_elu, apply_log_softmax):
    nheads = wh_ref.shape[0]

    # additive mask computed ONCE per tile and reused by every head
    adj = adj_ref[...].astype(jnp.float32)            # int8 -> f32, [TM, N]
    neg_mask = jnp.where(adj > 0.0, 0.0, _NEG_INF)    # [TM, N] f32

    f1 = f1_ref[...]                                  # [TM, H] f32 (query side)
    f2t = f2t_ref[...]                                # [H, N]  f32 (key side, pre-transposed)

    outs = []
    for h in range(nheads):                           # static unroll over heads
        e = f1[:, h:h + 1] + f2t[h:h + 1, :]          # [TM, N] broadcast add (pure VPU)
        e = jnp.maximum(e, alpha * e)                 # LeakyReLU (alpha in (0,1))
        e = e + neg_mask                              # adjacency masking (additive)

        m = jnp.max(e, axis=1, keepdims=True)
        p = jnp.exp(e - m)
        denom = jnp.sum(p, axis=1, keepdims=True)
        att = p * pl.reciprocal(denom, approx=True)   # EUP reciprocal

        h_out = jnp.dot(att.astype(wh_ref.dtype), wh_ref[h],
                        preferred_element_type=jnp.float32)   # [TM, Fout] f32
        if apply_elu:
            h_out = jnp.where(h_out > 0.0, h_out, jnp.exp(h_out) - 1.0)
        outs.append(h_out)

    out = jnp.concatenate(outs, axis=1) if nheads > 1 else outs[0]  # [TM, H*Fout]
    if apply_log_softmax:
        mm = jnp.max(out, axis=1, keepdims=True)
        lse = jnp.log(jnp.sum(jnp.exp(out - mm), axis=1, keepdims=True)) + mm
        out = out - lse
    out_ref[...] = out.astype(out_ref.dtype)          # lane-dense store


# --------------------------------------------------------------------------- #
# Wrappers
# --------------------------------------------------------------------------- #
def _pick_tile(n, max_tile):
    # max_tile is a multiple of 8; full-array tile when n is small
    return n if n <= max_tile else max_tile


def _clamp_vmem(est_bytes):
    # size scoped VMEM to the tiles (with pipelining headroom); stay below
    # v7x's 64 MiB physical VMEM, never below the 32 MiB v6e/v7x default.
    return int(min(56 * 1024 * 1024, max(32 * 1024 * 1024, 4 * est_bytes)))


def gat_attention_layer(x, adj_i8, w, a1, a2, *, alpha, apply_elu,
                        apply_log_softmax, tile_proj=512, tile_attn=256):
    """One fused multi-head GraphAttentionLayer.

    x: [N, Fin]  adj_i8: [N, N] int8  w: [H, Fin, Fout]  a1/a2: [H, Fout]
    Returns the head-concatenated output [N, H*Fout] (f32).
    NOTE: on v7x (64 MiB VMEM) use a smaller tile_attn (e.g. 128) for large N.
    """
    n, fin = x.shape
    nheads, _, fout = w.shape

    xb = x.astype(jnp.bfloat16)
    wb = w.astype(jnp.bfloat16)
    a1f = a1.astype(jnp.float32)
    a2f = a2.astype(jnp.float32)

    # ---- stage 1: projection + score halves (row-tiled, parallel) ----
    tm1 = _pick_tile(n, tile_proj)
    est1 = 2 * (tm1 * fin * 2 + nheads * tm1 * fout * 2 + 2 * tm1 * nheads * 4) \
        + nheads * fin * fout * 2
    wh, f1, f2 = pl.pallas_call(
        _proj_kernel,
        out_shape=(
            jax.ShapeDtypeStruct((nheads, n, fout), jnp.bfloat16),
            jax.ShapeDtypeStruct((n, nheads), jnp.float32),
            jax.ShapeDtypeStruct((n, nheads), jnp.float32),
        ),
        grid=(pl.cdiv(n, tm1),),
        in_specs=[
            pl.BlockSpec((tm1, fin), lambda i: (i, 0)),
            pl.BlockSpec((nheads, fin, fout), lambda i: (0, 0, 0)),   # resident
            pl.BlockSpec((nheads, fout), lambda i: (0, 0)),
            pl.BlockSpec((nheads, fout), lambda i: (0, 0)),
        ],
        out_specs=(
            pl.BlockSpec((nheads, tm1, fout), lambda i: (0, i, 0)),
            pl.BlockSpec((tm1, nheads), lambda i: (i, 0)),
            pl.BlockSpec((tm1, nheads), lambda i: (i, 0)),
        ),
        compiler_params=pltpu.CompilerParams(
            dimension_semantics=("parallel",),
            vmem_limit_bytes=_clamp_vmem(est1)),
    )(xb, wb, a1f, a2f)

    # key-side scores as [H, N] rows so the attention kernel never transposes
    f2t = f2.T

    # ---- stage 2: masked attention + softmax + aggregation (row-tiled) ----
    tm2 = _pick_tile(n, tile_attn)
    est2 = (2 * tm2 * n                      # adj int8, double-buffered
            + 6 * tm2 * n * 4                # f32 temporaries (mask, e, p, att)
            + nheads * n * fout * 2          # resident Wh (bf16)
            + 2 * tm2 * nheads * fout * 4)   # output tile
    kernel = functools.partial(_attn_kernel, alpha=alpha,
                               apply_elu=apply_elu,
                               apply_log_softmax=apply_log_softmax)
    out = pl.pallas_call(
        kernel,
        out_shape=jax.ShapeDtypeStruct((n, nheads * fout), jnp.float32),
        grid=(pl.cdiv(n, tm2),),
        in_specs=[
            pl.BlockSpec((tm2, n), lambda i: (i, 0)),                 # adj tile (int8)
            pl.BlockSpec((tm2, nheads), lambda i: (i, 0)),            # query scores
            pl.BlockSpec((nheads, n), lambda i: (0, 0)),              # key scores (resident)
            pl.BlockSpec((nheads, n, fout), lambda i: (0, 0, 0)),     # Wh (resident)
        ],
        out_specs=pl.BlockSpec((tm2, nheads * fout), lambda i: (i, 0)),
        compiler_params=pltpu.CompilerParams(
            dimension_semantics=("parallel",),
            vmem_limit_bytes=_clamp_vmem(est2)),
    )(adj_i8, f1, f2t, wh)
    return out


def gat_forward(x, adj, params, *, alpha):
    adj_i8 = (adj > 0).astype(jnp.int8)    # compact mask dtype for the O(N^2) stream
    # F.dropout(x) -> identity in eval mode
    h = gat_attention_layer(x, adj_i8, params["w_heads"], params["a1_heads"],
                            params["a2_heads"], alpha=alpha,
                            apply_elu=True, apply_log_softmax=False)
    # second dropout -> identity in eval mode
    # out_att (concat=False) -> elu -> log_softmax, fused in-kernel
    return gat_attention_layer(h, adj_i8, params["w_out"], params["a1_out"],
                               params["a2_out"], alpha=alpha,
                               apply_elu=True, apply_log_softmax=True)


# --------------------------------------------------------------------------- #
# Params / reference / main
# --------------------------------------------------------------------------- #
def xavier_uniform(key, shape, gain=1.414):
    fan_in, fan_out = shape
    bound = gain * jnp.sqrt(6.0 / (fan_in + fan_out))
    return jax.random.uniform(key, shape, jnp.float32, -bound, bound)


def init_gat_params(key, nfeat, nhid, nclass, nheads):
    w_heads, a1_heads, a2_heads = [], [], []
    for _ in range(nheads):
        key, kw, ka = jax.random.split(key, 3)
        w = xavier_uniform(kw, (nfeat, nhid))
        a = xavier_uniform(ka, (2 * nhid, 1))
        w_heads.append(w)
        a1_heads.append(a[:nhid, 0])
        a2_heads.append(a[nhid:, 0])
    key, kw, ka = jax.random.split(key, 3)
    wo = xavier_uniform(kw, (nhid * nheads, nclass))
    ao = xavier_uniform(ka, (2 * nclass, 1))
    return {
        "w_heads": jnp.stack(w_heads),          # [H, nfeat, nhid]
        "a1_heads": jnp.stack(a1_heads),        # [H, nhid]
        "a2_heads": jnp.stack(a2_heads),        # [H, nhid]
        "w_out": wo[None],                      # [1, nhid*nheads, nclass]
        "a1_out": ao[:nclass, 0][None],         # [1, nclass]
        "a2_out": ao[nclass:, 0][None],         # [1, nclass]
    }


def _layer_reference(xin, adj, w, a1, a2, *, alpha, apply_elu, apply_log_softmax):
    """Plain-jnp reference mirroring the kernel's precision choices (bf16 MXU)."""
    nheads = w.shape[0]
    xb = xin.astype(jnp.bfloat16)
    heads = []
    for h in range(nheads):
        wh = jnp.dot(xb, w[h].astype(jnp.bfloat16), preferred_element_type=jnp.float32)
        f1 = jnp.sum(wh * a1[h][None, :], axis=-1, keepdims=True)
        f2 = jnp.sum(wh * a2[h][None, :], axis=-1, keepdims=True)
        e = f1 + f2.T
        e = jnp.where(e > 0, e, alpha * e)
        e = jnp.where(adj > 0, e, _NEG_INF)
        att = jax.nn.softmax(e, axis=1)
        hh = jnp.dot(att.astype(jnp.bfloat16), wh.astype(jnp.bfloat16),
                     preferred_element_type=jnp.float32)
        if apply_elu:
            hh = jnp.where(hh > 0, hh, jnp.exp(hh) - 1.0)
        heads.append(hh)
    out = jnp.concatenate(heads, axis=1)
    if apply_log_softmax:
        out = jax.nn.log_softmax(out, axis=1)
    return out


def gat_reference(x, adj, params, *, alpha):
    h = _layer_reference(x, adj, params["w_heads"], params["a1_heads"],
                         params["a2_heads"], alpha=alpha,
                         apply_elu=True, apply_log_softmax=False)
    return _layer_reference(h, adj, params["w_out"], params["a1_out"],
                            params["a2_out"], alpha=alpha,
                            apply_elu=True, apply_log_softmax=True)


if __name__ == "__main__":
    # small, GAT-consistent shapes
    N, nfeat, nhid, nclass, nheads = 16, 32, 8, 4, 4
    alpha = 0.2

    key = jax.random.PRNGKey(0)
    kx, kadj, kp = jax.random.split(key, 3)

    x = jax.random.normal(kx, (N, nfeat), jnp.float32)
    # random symmetric binary adjacency with self loops
    a = (jax.random.uniform(kadj, (N, N)) > 0.6).astype(jnp.float32)
    adj = jnp.clip(a + a.T + jnp.eye(N, dtype=jnp.float32), 0.0, 1.0)

    params = init_gat_params(kp, nfeat, nhid, nclass, nheads)

    out = jax.block_until_ready(gat_forward(x, adj, params, alpha=alpha))

    assert out.shape == (N, nclass)
    assert bool(jnp.all(jnp.isfinite(out)))
    # rows of log_softmax should exp-sum to ~1
    assert jnp.allclose(jnp.sum(jnp.exp(out), axis=1), 1.0, atol=1e-3)
    # compare against a same-precision plain-jnp reference
    ref = gat_reference(x, adj, params, alpha=alpha)
    assert jnp.allclose(out, ref, atol=5e-2, rtol=5e-2)

    print("KERNEL_OK")
</pallas_src>

<mosaic_0001>
module attributes {stable_mosaic.version = 11 : i64} {
  func.func @_proj_kernel(%arg0: i32, %arg1: memref<16x32xbf16, #tpu.memory_space<vmem>>, %arg2: memref<4x32x8xbf16, #tpu.memory_space<vmem>>, %arg3: memref<4x8xf32, #tpu.memory_space<vmem>>, %arg4: memref<4x8xf32, #tpu.memory_space<vmem>>, %arg5: memref<4x16x8xbf16, #tpu.memory_space<vmem>>, %arg6: memref<16x4xf32, #tpu.memory_space<vmem>>, %arg7: memref<16x4xf32, #tpu.memory_space<vmem>>) attributes {dimension_semantics = [#tpu.dimension_semantics<parallel>], iteration_bounds = array<i64: 1>, scalar_prefetch = 0 : i64, scratch_operands = 0 : i64, tpu.core_type = #tpu.core_type<tc>, window_params = [{transform_indices = @transform_0, window_bounds = array<i64: 16, 32>}, {pipeline_mode = #tpu.pipeline_mode<synchronous>, transform_indices = @transform_1, window_bounds = array<i64: 4, 32, 8>}, {pipeline_mode = #tpu.pipeline_mode<synchronous>, transform_indices = @transform_2, window_bounds = array<i64: 4, 8>}, {pipeline_mode = #tpu.pipeline_mode<synchronous>, transform_indices = @transform_3, window_bounds = array<i64: 4, 8>}, {transform_indices = @transform_4, window_bounds = array<i64: 4, 16, 8>}, {transform_indices = @transform_5, window_bounds = array<i64: 16, 4>}, {transform_indices = @transform_6, window_bounds = array<i64: 16, 4>}]} {
    %c0 = arith.constant 0 : index
    %c0_0 = arith.constant 0 : index
    %0 = vector.load %arg1[%c0, %c0_0] : memref<16x32xbf16, #tpu.memory_space<vmem>>, vector<16x32xbf16>
    %c0_1 = arith.constant 0 : index
    %c0_2 = arith.constant 0 : index
    %1 = vector.load %arg3[%c0_1, %c0_2] : memref<4x8xf32, #tpu.memory_space<vmem>>, vector<4x8xf32>
    %c0_3 = arith.constant 0 : index
    %c0_4 = arith.constant 0 : index
    %2 = vector.load %arg4[%c0_3, %c0_4] : memref<4x8xf32, #tpu.memory_space<vmem>>, vector<4x8xf32>
    %c0_5 = arith.constant 0 : index
    %c0_6 = arith.constant 0 : index
    %c0_7 = arith.constant 0 : index
    %3 = vector.load %arg2[%c0_5, %c0_6, %c0_7] : memref<4x32x8xbf16, #tpu.memory_space<vmem>>, vector<1x32x8xbf16>
    %4 = vector.shape_cast %3 : vector<1x32x8xbf16> to vector<32x8xbf16>
    %cst = arith.constant dense<0.000000e+00> : vector<16x8xf32>
    %5 = tpu.matmul %0, %4, %cst {dimension_numbers = #tpu.dot_dimension_numbers<[1], [0], [0], [1], [0, 0, 1, 1], [], []>} : vector<16x32xbf16>, vector<32x8xbf16>, vector<16x8xf32> -> vector<16x8xf32>
    %6 = vector.extract_strided_slice %1 {offsets = [0, 0], sizes = [1, 8], strides = [1, 1]} : vector<4x8xf32> to vector<1x8xf32>
    %7 = vector.broadcast %6 : vector<1x8xf32> to vector<16x8xf32>
    %8 = arith.mulf %5, %7 : vector<16x8xf32>
    %cst_8 = arith.constant dense<0.000000e+00> : vector<16xf32>
    %9 = vector.multi_reduction <add>, %8, %cst_8 [1] : vector<16x8xf32> to vector<16xf32>
    %10 = vector.shape_cast %9 : vector<16xf32> to vector<16x1xf32>
    %11 = vector.extract_strided_slice %2 {offsets = [0, 0], sizes = [1, 8], strides = [1, 1]} : vector<4x8xf32> to vector<1x8xf32>
    %12 = vector.broadcast %11 : vector<1x8xf32> to vector<16x8xf32>
    %13 = arith.mulf %5, %12 : vector<16x8xf32>
    %cst_9 = arith.constant dense<0.000000e+00> : vector<16xf32>
    %14 = vector.multi_reduction <add>, %13, %cst_9 [1] : vector<16x8xf32> to vector<16xf32>
    %15 = vector.shape_cast %14 : vector<16xf32> to vector<16x1xf32>
    %16 = arith.truncf %5 : vector<16x8xf32> to vector<16x8xbf16>
    %c0_10 = arith.constant 0 : index
    %c0_11 = arith.constant 0 : index
    %c0_12 = arith.constant 0 : index
    %17 = vector.load %arg5[%c0_10, %c0_11, %c0_12] : memref<4x16x8xbf16, #tpu.memory_space<vmem>>, vector<1x16x8xbf16>
    %18 = vector.shape_cast %17 : vector<1x16x8xbf16> to vector<16x8xbf16>
    %19 = vector.shape_cast %16 : vector<16x8xbf16> to vector<1x16x8xbf16>
    tpu.vector_store %arg5[%c0_10, %c0_11, %c0_12], %19 {strides = array<i32>} : memref<4x16x8xbf16, #tpu.memory_space<vmem>>, vector<1x16x8xbf16>,
    %c1 = arith.constant 1 : index
    %c0_13 = arith.constant 0 : index
    %c0_14 = arith.constant 0 : index
    %20 = vector.load %arg2[%c1, %c0_13, %c0_14] : memref<4x32x8xbf16, #tpu.memory_space<vmem>>, vector<1x32x8xbf16>
    %21 = vector.shape_cast %20 : vector<1x32x8xbf16> to vector<32x8xbf16>
    %cst_15 = arith.constant dense<0.000000e+00> : vector<16x8xf32>
    %22 = tpu.matmul %0, %21, %cst_15 {dimension_numbers = #tpu.dot_dimension_numbers<[1], [0], [0], [1], [0, 0, 1, 1], [], []>} : vector<16x32xbf16>, vector<32x8xbf16>, vector<16x8xf32> -> vector<16x8xf32>
    %23 = vector.extract_strided_slice %1 {offsets = [1, 0], sizes = [1, 8], strides = [1, 1]} : vector<4x8xf32> to vector<1x8xf32>
    %24 = vector.broadcast %23 : vector<1x8xf32> to vector<16x8xf32>
    %25 = arith.mulf %22, %24 : vector<16x8xf32>
    %cst_16 = arith.constant dense<0.000000e+00> : vector<16xf32>
    %26 = vector.multi_reduction <add>, %25, %cst_16 [1] : vector<16x8xf32> to vector<16xf32>
    %27 = vector.shape_cast %26 : vector<16xf32> to vector<16x1xf32>
    %28 = vector.extract_strided_slice %2 {offsets = [1, 0], sizes = [1, 8], strides = [1, 1]} : vector<4x8xf32> to vector<1x8xf32>
    %29 = vector.broadcast %28 : vector<1x8xf32> to vector<16x8xf32>
    %30 = arith.mulf %22, %29 : vector<16x8xf32>
    %cst_17 = arith.constant dense<0.000000e+00> : vector<16xf32>
    %31 = vector.multi_reduction <add>, %30, %cst_17 [1] : vector<16x8xf32> to vector<16xf32>
    %32 = vector.shape_cast %31 : vector<16xf32> to vector<16x1xf32>
    %33 = arith.truncf %22 : vector<16x8xf32> to vector<16x8xbf16>
    %c1_18 = arith.constant 1 : index
    %c0_19 = arith.constant 0 : index
    %c0_20 = arith.constant 0 : index
    %34 = vector.load %arg5[%c1_18, %c0_19, %c0_20] : memref<4x16x8xbf16, #tpu.memory_space<vmem>>, vector<1x16x8xbf16>
    %35 = vector.shape_cast %34 : vector<1x16x8xbf16> to vector<16x8xbf16>
    %36 = vector.shape_cast %33 : vector<16x8xbf16> to vector<1x16x8xbf16>
    tpu.vector_store %arg5[%c1_18, %c0_19, %c0_20], %36 {strides = array<i32>} : memref<4x16x8xbf16, #tpu.memory_space<vmem>>, vector<1x16x8xbf16>,
    %c2 = arith.constant 2 : index
    %c0_21 = arith.constant 0 : index
    %c0_22 = arith.constant 0 : index
    %37 = vector.load %arg2[%c2, %c0_21, %c0_22] : memref<4x32x8xbf16, #tpu.memory_space<vmem>>, vector<1x32x8xbf16>
    %38 = vector.shape_cast %37 : vector<1x32x8xbf16> to vector<32x8xbf16>
    %cst_23 = arith.constant dense<0.000000e+00> : vector<16x8xf32>
    %39 = tpu.matmul %0, %38, %cst_23 {dimension_numbers = #tpu.dot_dimension_numbers<[1], [0], [0], [1], [0, 0, 1, 1], [], []>} : vector<16x32xbf16>, vector<32x8xbf16>, vector<16x8xf32> -> vector<16x8xf32>
    %40 = vector.extract_strided_slice %1 {offsets = [2, 0], sizes = [1, 8], strides = [1, 1]} : vector<4x8xf32> to vector<1x8xf32>
    %41 = vector.broadcast %40 : vector<1x8xf32> to vector<16x8xf32>
    %42 = arith.mulf %39, %41 : vector<16x8xf32>
    %cst_24 = arith.constant dense<0.000000e+00> : vector<16xf32>
    %43 = vector.multi_reduction <add>, %42, %cst_24 [1] : vector<16x8xf32> to vector<16xf32>
    %44 = vector.shape_cast %43 : vector<16xf32> to vector<16x1xf32>
    %45 = vector.extract_strided_slice %2 {offsets = [2, 0], sizes = [1, 8], strides = [1, 1]} : vector<4x8xf32> to vector<1x8xf32>
    %46 = vector.broadcast %45 : vector<1x8xf32> to vector<16x8xf32>
    %47 = arith.mulf %39, %46 : vector<16x8xf32>
    %cst_25 = arith.constant dense<0.000000e+00> : vector<16xf32>
    %48 = vector.multi_reduction <add>, %47, %cst_25 [1] : vector<16x8xf32> to vector<16xf32>
    %49 = vector.shape_cast %48 : vector<16xf32> to vector<16x1xf32>
    %50 = arith.truncf %39 : vector<16x8xf32> to vector<16x8xbf16>
    %c2_26 = arith.constant 2 : index
    %c0_27 = arith.constant 0 : index
    %c0_28 = arith.constant 0 : index
    %51 = vector.load %arg5[%c2_26, %c0_27, %c0_28] : memref<4x16x8xbf16, #tpu.memory_space<vmem>>, vector<1x16x8xbf16>
    %52 = vector.shape_cast %51 : vector<1x16x8xbf16> to vector<16x8xbf16>
    %53 = vector.shape_cast %50 : vector<16x8xbf16> to vector<1x16x8xbf16>
    tpu.vector_store %arg5[%c2_26, %c0_27, %c0_28], %53 {strides = array<i32>} : memref<4x16x8xbf16, #tpu.memory_space<vmem>>, vector<1x16x8xbf16>,
    %c3 = arith.constant 3 : index
    %c0_29 = arith.constant 0 : index
    %c0_30 = arith.constant 0 : index
    %54 = vector.load %arg2[%c3, %c0_29, %c0_30] : memref<4x32x8xbf16, #tpu.memory_space<vmem>>, vector<1x32x8xbf16>
    %55 = vector.shape_cast %54 : vector<1x32x8xbf16> to vector<32x8xbf16>
    %cst_31 = arith.constant dense<0.000000e+00> : vector<16x8xf32>
    %56 = tpu.matmul %0, %55, %cst_31 {dimension_numbers = #tpu.dot_dimension_numbers<[1], [0], [0], [1], [0, 0, 1, 1], [], []>} : vector<16x32xbf16>, vector<32x8xbf16>, vector<16x8xf32> -> vector<16x8xf32>
    %57 = vector.extract_strided_slice %1 {offsets = [3, 0], sizes = [1, 8], strides = [1, 1]} : vector<4x8xf32> to vector<1x8xf32>
    %58 = vector.broadcast %57 : vector<1x8xf32> to vector<16x8xf32>
    %59 = arith.mulf %56, %58 : vector<16x8xf32>
    %cst_32 = arith.constant dense<0.000000e+00> : vector<16xf32>
    %60 = vector.multi_reduction <add>, %59, %cst_32 [1] : vector<16x8xf32> to vector<16xf32>
    %61 = vector.shape_cast %60 : vector<16xf32> to vector<16x1xf32>
    %62 = vector.extract_strided_slice %2 {offsets = [3, 0], sizes = [1, 8], strides = [1, 1]} : vector<4x8xf32> to vector<1x8xf32>
    %63 = vector.broadcast %62 : vector<1x8xf32> to vector<16x8xf32>
    %64 = arith.mulf %56, %63 : vector<16x8xf32>
    %cst_33 = arith.constant dense<0.000000e+00> : vector<16xf32>
    %65 = vector.multi_reduction <add>, %64, %cst_33 [1] : vector<16x8xf32> to vector<16xf32>
    %66 = vector.shape_cast %65 : vector<16xf32> to vector<16x1xf32>
    %67 = arith.truncf %56 : vector<16x8xf32> to vector<16x8xbf16>
    %c3_34 = arith.constant 3 : index
    %c0_35 = arith.constant 0 : index
    %c0_36 = arith.constant 0 : index
    %68 = vector.load %arg5[%c3_34, %c0_35, %c0_36] : memref<4x16x8xbf16, #tpu.memory_space<vmem>>, vector<1x16x8xbf16>
    %69 = vector.shape_cast %68 : vector<1x16x8xbf16> to vector<16x8xbf16>
    %70 = vector.shape_cast %67 : vector<16x8xbf16> to vector<1x16x8xbf16>
    tpu.vector_store %arg5[%c3_34, %c0_35, %c0_36], %70 {strides = array<i32>} : memref<4x16x8xbf16, #tpu.memory_space<vmem>>, vector<1x16x8xbf16>,
    %71 = tpu.concatenate %10, %27, %44, %61 in 1 : vector<16x1xf32>, vector<16x1xf32>, vector<16x1xf32>, vector<16x1xf32> -> vector<16x4xf32>
    %c0_37 = arith.constant 0 : index
    %c0_38 = arith.constant 0 : index
    %72 = vector.load %arg6[%c0_37, %c0_38] : memref<16x4xf32, #tpu.memory_space<vmem>>, vector<16x4xf32>
    tpu.vector_store %arg6[%c0_37, %c0_38], %71 {strides = array<i32>} : memref<16x4xf32, #tpu.memory_space<vmem>>, vector<16x4xf32>,
    %73 = tpu.concatenate %15, %32, %49, %66 in 1 : vector<16x1xf32>, vector<16x1xf32>, vector<16x1xf32>, vector<16x1xf32> -> vector<16x4xf32>
    %c0_39 = arith.constant 0 : index
    %c0_40 = arith.constant 0 : index
    %74 = vector.load %arg7[%c0_39, %c0_40] : memref<16x4xf32, #tpu.memory_space<vmem>>, vector<16x4xf32>
    tpu.vector_store %arg7[%c0_39, %c0_40], %73 {strides = array<i32>} : memref<16x4xf32, #tpu.memory_space<vmem>>, vector<16x4xf32>,
    return
  }
  func.func @transform_0(%arg0: i32) -> (i32, i32) {
    %c0_i32 = arith.constant 0 : i32
    %c0_i32_0 = arith.constant 0 : i32
    return %arg0, %c0_i32 : i32, i32
  }
  func.func @transform_1(%arg0: i32) -> (i32, i32, i32) {
    %c0_i32 = arith.constant 0 : i32
    %c0_i32_0 = arith.constant 0 : i32
    %c0_i32_1 = arith.constant 0 : i32
    %c0_i32_2 = arith.constant 0 : i32
    return %c0_i32, %c0_i32_0, %c0_i32_1 : i32, i32, i32
  }
  func.func @transform_2(%arg0: i32) -> (i32, i32) {
    %c0_i32 = arith.constant 0 : i32
    %c0_i32_0 = arith.constant 0 : i32
    %c0_i32_1 = arith.constant 0 : i32
    return %c0_i32, %c0_i32_0 : i32, i32
  }
  func.func @transform_3(%arg0: i32) -> (i32, i32) {
    %c0_i32 = arith.constant 0 : i32
    %c0_i32_0 = arith.constant 0 : i32
    %c0_i32_1 = arith.constant 0 : i32
    return %c0_i32, %c0_i32_0 : i32, i32
  }
  func.func @transform_4(%arg0: i32) -> (i32, i32, i32) {
    %c0_i32 = arith.constant 0 : i32
    %c0_i32_0 = arith.constant 0 : i32
    %c0_i32_1 = arith.constant 0 : i32
    return %c0_i32, %arg0, %c0_i32_0 : i32, i32, i32
  }
  func.func @transform_5(%arg0: i32) -> (i32, i32) {
    %c0_i32 = arith.constant 0 : i32
    %c0_i32_0 = arith.constant 0 : i32
    return %arg0, %c0_i32 : i32, i32
  }
  func.func @transform_6(%arg0: i32) -> (i32, i32) {
    %c0_i32 = arith.constant 0 : i32
    %c0_i32_0 = arith.constant 0 : i32
    return %arg0, %c0_i32 : i32, i32
  }
}

</mosaic_0001>

<bundles_post_ra>
// kernel: tpu_custom_call.1
= control target key start
LH: loop header
LB: loop body
LE: loop exit
PB: predicated region body
PF: predicated region fallthrough
CT: control target
= control target key end

     0   :  { %v540_v0 = vmov 0.0   ;;  %vm541_vm0 = vmmov 0   ;;  %vm46_vm1 = vcmask 261120   ;;  %v91_v10 = vlaneseq  ;;  %s712_s1 = inlined_call_operand.vmem [shape: bf16[4,32,8], index: 1, kind: input, shape index: {}]   ;;  %s713_s0 = inlined_call_operand.vmem [shape: bf16[16,32], index: 0, kind: input, shape index: {}]   ;;  %s714_s3 = inlined_call_operand.vmem [shape: f32[4,8], index: 3, kind: input, shape index: {}]   ;;  %s715_s2 = inlined_call_operand.vmem [shape: f32[4,8], index: 2, kind: input, shape index: {}]   ;;  %s716_s4 = inlined_call_operand.vmem [shape: bf16[4,16,8], index: 4, kind: output, shape index: {0}]   ;;  %s717_s5 = inlined_call_operand.vmem [shape: f32[16,4], index: 5, kind: output, shape index: {1}]   ;;  %s718_s6 = inlined_call_operand.vmem [shape: f32[16,4], index: 6, kind: output, shape index: {2}]  }
   0x1   :  { %497 = vmatprep.subr.bf16.mxu0 %v540_v0  ;;  %v531_v1 = vld [vmem:[%s712_s1] sm:$0xff]   ;;  %505 = vmatprep.subr.bf16.mxu1 %v540_v0  ;;  %v532_v2 = vld [vmem:[%s712_s1 + $0x10] sm:$0xff]   ;;  %v533_v3 = vld [vmem:[%s712_s1 + $0x8] sm:$0xff]   ;;  %vm124_vm2 = vcmask 60416   ;;  %vm97_vm3 = vcmask 64512   ;;  %vm406_vm4 = vcmask 7168  }
   0x2   :  { %501 = vmatprep.mubr.msk.bf16.mxu0 %vm541_vm0, %v540_v0  ;;  %509 = vmatprep.mubr.msk.bf16.mxu1 %vm541_vm0, %v540_v0  ;;  %v534_v4 = vld [vmem:[%s712_s1 + $0x18] sm:$0xff]   ;;  %v535_v5 = vld [vmem:[%s713_s0] sm:$0xff]   ;;  %v538_v7 = vld [vmem:[%s712_s1 + $0x30] sm:$0xff]   ;;  %v612_v11 = vshrl.u32 %v91_v10, 7  ;;  %vm409_vm5 = vcmask 15360   ;;  %vm412_vm6 = vcmask 23552  }
   0x3   :  { %498 = vmatpush3.bf16.msra.mxu0 %v531_v1  ;;  %506 = vmatpush3.bf16.msra.mxu1 %v532_v2  ;;  %v536_v6 = vld [vmem:[%s712_s1 + $0x20] sm:$0xff]   ;;  %v537_v8 = vld [vmem:[%s712_s1 + $0x28] sm:$0xff]   ;;  %v539_v9 = vld [vmem:[%s712_s1 + $0x38] sm:$0xff]   ;;  %vm415_vm7 = vcmask 31744  }
   0x4   :  { %499 = vmatprep.subr.bf16.mxu0 %v540_v0  ;;  %507 = vmatprep.subr.bf16.mxu1 %v540_v0  ;;  %v93_v12 = vsub.s32 0, %v612_v11  ;;  %v618_v13 = vld [vmem:[%s714_s3] sm:$0xf]  ;;  %v187_v15 = vsub.s32 1, %v612_v11  ;;  %v280_v40 = vsub.s32 2, %v612_v11  ;;  %v373_v61 = vsub.s32 3, %v612_v11 }
   0x5   :  { %v623_v14 = vld [vmem:[%s715_s2] sm:$0xf] }
   0x6   :  { %v107_v16 = vrot.slane %v618_v13, %v93_v12  ;;  %v94_v17 = vrot.slane %v623_v14, %v93_v12  ;;  %v188_v18 = vrot.slane %v623_v14, %v187_v15  ;;  %v200_v29 = vrot.slane %v618_v13, %v187_v15 }
   0x7   :  { %500 = vmatpush3.bf16.msra.mxu0 %v533_v3  ;;  %508 = vmatpush3.bf16.msra.mxu1 %v534_v4  ;;  %v281_v50 = vrot.slane %v623_v14, %v280_v40  ;;  %v293_v60 = vrot.slane %v618_v13, %v280_v40  ;;  %v374_v2 = vrot.slane %v623_v14, %v373_v61 }
   0x8   :  { %513 = vmatprep.subr.bf16.mxu0 %v540_v0  ;;  %521 = vmatprep.subr.bf16.mxu1 %v540_v0 }
   0xa   :  { %502 = vmatmul.mubr.msk.bf16.vlgmr.msra.gmra.mrb[0].mxu0 %vm46_vm1, %v535_v5  ;;  %510 = vmatmul.mubr.msk.bf16.vlgmr.msra.gmra.mrb[0].mxu1 %vm46_vm1, %v535_v5 }
   0xb   :  { %514 = vmatpush3.bf16.msra.mxu0 %v536_v6  ;;  %517 = vmatprep.mubr.msk.bf16.mxu0 %vm541_vm0, %v540_v0 }
   0xc   :  { %515 = vmatprep.subr.bf16.mxu0 %v540_v0  ;;  %522 = vmatpush3.bf16.msra.mxu1 %v538_v7  ;;  %v386_v7 = vrot.slane %v618_v13, %v373_v61 }
   0xd   :  { %525 = vmatprep.mubr.msk.bf16.mxu1 %vm541_vm0, %v540_v0  ;;  %523 = vmatprep.subr.bf16.mxu1 %v540_v0 }
   0xf   :  { %516 = vmatpush3.bf16.msra.mxu0 %v537_v8 }
  0x10   :  { %524 = vmatpush3.bf16.msra.mxu1 %v539_v9 }
  0x12   :  { %518 = vmatmul.mubr.msk.bf16.vlgmr.msra.gmra.mrb[4].mxu0 %vm46_vm1, %v535_v5 }
  0x13   :  { %526 = vmatmul.mubr.msk.bf16.vlgmr.msra.gmra.mrb[4].mxu1 %vm46_vm1, %v535_v5 }
  0xdd   :  { %v84_v19 = vpop.f32.mrb[0].mxu0  ;;  %v178_v22 = vpop.f32.mrb[0].mxu1 }
  0xde   :  { %v477_v20 = vpack.c.bf16 %v84_v19, %v84_v19  ;;  %v503_v21 = vpop.f32.mrb[1].mxu0  ;;  %v108_v23 = vmul.f32 %v107_v16, %v84_v19  ;;  %v95_v24 = vmul.f32 %v94_v17, %v84_v19  ;;  %v479_v25 = vpack.c.bf16 %v178_v22, %v178_v22  ;;  %v511_v27 = vpop.f32.mrb[1].mxu1 }
  0xdf   :  { %v87_v26 = vpop.f32.mrb[2].mxu0  ;;  %v189_v28 = vmul.f32 %v188_v18, %v178_v22  ;;  %v181_v32 = vpop.f32.mrb[2].mxu1  ;;  %v201_v39 = vmul.f32 %v200_v29, %v178_v22 }
  0xe0   :  { %125 = vst.msk [vmem:[%s716_s4] sm:$0xf] %vm124_vm2, %v477_v20  ;;  %v478_v30 = vpack.c.bf16 %v87_v26, %v87_v26  ;;  %v504_v31 = vpop.f32.mrb[3].mxu0  ;;  %v110_v33 = vsel %vm97_vm3, %v108_v23, 0.0  ;;  %v98_v34 = vsel %vm97_vm3, %v95_v24, 0.0  ;;  %v109_v35 = vmul.f32 %v107_v16, %v87_v26  ;;  %v512_v37 = vpop.f32.mrb[3].mxu1 }
  0xe1   :  { %453 = vst.msk [vmem:[%s716_s4 + $0x8] sm:$0xf] %vm124_vm2, %v479_v25  ;;  %v480_v36 = vpack.c.bf16 %v181_v32, %v181_v32  ;;  %111 = vadd.xlane.f32.xlu1 %v110_v33  ;;  %99 = vadd.xlane.f32.xlu0 %v98_v34  ;;  %v191_v38 = vsel %vm97_vm3, %v189_v28, 0.0  ;;  %v190_v42 = vmul.f32 %v188_v18, %v181_v32  ;;  %v203_v46 = vsel %vm97_vm3, %v201_v39, 0.0 }
  0xe2   :  { %126 = vst.msk [vmem:[%s716_s4 + $0x4] sm:$0xf] %vm124_vm2, %v478_v30  ;;  %v113_v41 = vsel %vm97_vm3, %v109_v35, 0.0  ;;  %v202_v48 = vmul.f32 %v200_v29, %v181_v32  ;;  %v96_v54 = vmul.f32 %v94_v17, %v87_v26 }
  0xe3   :  { %454 = vst.msk [vmem:[%s716_s4 + $0xc] sm:$0xf] %vm124_vm2, %v480_v36  ;;  %v194_v51 = vsel %vm97_vm3, %v190_v42, 0.0 }
  0xe4   :  { %v206_v62 = vsel %vm97_vm3, %v202_v48, 0.0  ;;  %v101_v63 = vsel %vm97_vm3, %v96_v54, 0.0 }
  0xe5   :  { %192 = vadd.xlane.f32.xlu0 %v191_v38  ;;  %114 = vadd.xlane.f32.xlu1 %v113_v41  ;;  %v271_v43 = vpop.f32.mrb[4].mxu0 }
  0xe6   :  { %v481_v44 = vpack.c.bf16 %v271_v43, %v271_v43  ;;  %v519_v45 = vpop.f32.mrb[5].mxu0  ;;  %v364_v49 = vpop.f32.mrb[4].mxu1  ;;  %v282_v0 = vmul.f32 %v281_v50, %v271_v43  ;;  %v294_v5 = vmul.f32 %v293_v60, %v271_v43 }
  0xe7   :  { %v274_v47 = vpop.f32.mrb[6].mxu0  ;;  %v483_v55 = vpack.c.bf16 %v364_v49, %v364_v49  ;;  %v527_v56 = vpop.f32.mrb[5].mxu1  ;;  %v375_v10 = vmul.f32 %v374_v2, %v364_v49  ;;  %v387_v15 = vmul.f32 %v386_v7, %v364_v49 }
  0xe8   :  { %464 = vst.msk [vmem:[%s716_s4 + $0x10] sm:$0xf] %vm124_vm2, %v481_v44  ;;  %v482_v52 = vpack.c.bf16 %v274_v47, %v274_v47  ;;  %v520_v53 = vpop.f32.mrb[7].mxu0  ;;  %v367_v57 = vpop.f32.mrb[6].mxu1  ;;  %v283_v1 = vmul.f32 %v281_v50, %v274_v47  ;;  %v284_v3 = vsel %vm97_vm3, %v282_v0, 0.0  ;;  %v295_v6 = vmul.f32 %v293_v60, %v274_v47 }
  0xe9   :  { %204 = vadd.xlane.f32.xlu0 %v203_v46  ;;  %195 = vadd.xlane.f32.xlu1 %v194_v51  ;;  %475 = vst.msk [vmem:[%s716_s4 + $0x18] sm:$0xf] %vm124_vm2, %v483_v55  ;;  %v484_v58 = vpack.c.bf16 %v367_v57, %v367_v57  ;;  %v528_v59 = vpop.f32.mrb[7].mxu1  ;;  %v296_v8 = vsel %vm97_vm3, %v294_v5, 0.0  ;;  %v376_v11 = vmul.f32 %v374_v2, %v367_v57  ;;  %v377_v12 = vsel %vm97_vm3, %v375_v10, 0.0 }
  0xea   :  { %465 = vst.msk [vmem:[%s716_s4 + $0x14] sm:$0xf] %vm124_vm2, %v482_v52  ;;  %v287_v4 = vsel %vm97_vm3, %v283_v1, 0.0  ;;  %v299_v9 = vsel %vm97_vm3, %v295_v6, 0.0  ;;  %v388_v16 = vmul.f32 %v386_v7, %v367_v57  ;;  %v389_v17 = vsel %vm97_vm3, %v387_v15, 0.0 }
  0xeb   :  { %476 = vst.msk [vmem:[%s716_s4 + $0x1c] sm:$0xf] %vm124_vm2, %v484_v58  ;;  %v380_v14 = vsel %vm97_vm3, %v376_v11, 0.0 }
  0xec   :  { %v392_v13 = vsel %vm97_vm3, %v388_v16, 0.0 }
  0xed   :  { %207 = vadd.xlane.f32.xlu1 %v206_v62  ;;  %102 = vadd.xlane.f32.xlu0 %v101_v63 }
  0xf1   :  { %285 = vadd.xlane.f32.xlu0 %v284_v3  ;;  %288 = vadd.xlane.f32.xlu1 %v287_v4 }
  0xf5   :  { %297 = vadd.xlane.f32.xlu0 %v296_v8  ;;  %300 = vadd.xlane.f32.xlu1 %v299_v9 }
  0xf9   :  { %378 = vadd.xlane.f32.xlu0 %v377_v12  ;;  %381 = vadd.xlane.f32.xlu1 %v380_v14 }
  0xfd   :  { %390 = vadd.xlane.f32.xlu0 %v389_v17  ;;  %393 = vadd.xlane.f32.xlu1 %v392_v13 }
 0x16e   :  { %v112_v18 = vpop.xlane.xlu1 %111  ;;  %v100_v19 = vpop.xlane.xlu0 %99 }
 0x172   :  { %v193_v20 = vpop.xlane.xlu0 %192  ;;  %v115_v21 = vpop.xlane.xlu1 %114 }
 0x173   :  { %v407_v30 = vsel %vm406_vm4, %v100_v19, %v193_v20 }
 0x176   :  { %v205_v22 = vpop.xlane.xlu0 %204  ;;  %v196_v23 = vpop.xlane.xlu1 %195 }
 0x177   :  { %v418_v38 = vsel %vm406_vm4, %v112_v18, %v205_v22 }
 0x17a   :  { %v208_v24 = vpop.xlane.xlu1 %207  ;;  %v103_v25 = vpop.xlane.xlu0 %102 }
 0x17b   :  { %v408_v31 = vsel %vm406_vm4, %v103_v25, %v196_v23  ;;  %v419_v39 = vsel %vm406_vm4, %v115_v21, %v208_v24 }
 0x17e   :  { %v286_v26 = vpop.xlane.xlu0 %285  ;;  %v289_v27 = vpop.xlane.xlu1 %288 }
 0x17f   :  { %v410_v32 = vsel %vm409_vm5, %v407_v30, %v286_v26  ;;  %v411_v33 = vsel %vm409_vm5, %v408_v31, %v289_v27 }
 0x182   :  { %v298_v28 = vpop.xlane.xlu0 %297  ;;  %v301_v29 = vpop.xlane.xlu1 %300 }
 0x183   :  { %v420_v40 = vsel %vm409_vm5, %v418_v38, %v298_v28  ;;  %v421_v41 = vsel %vm409_vm5, %v419_v39, %v301_v29 }
 0x186   :  { %v379_v34 = vpop.xlane.xlu0 %378  ;;  %v382_v35 = vpop.xlane.xlu1 %381 }
 0x187   :  { %v413_v36 = vsel %vm412_vm6, %v410_v32, %v379_v34  ;;  %v414_v37 = vsel %vm412_vm6, %v411_v33, %v382_v35 }
 0x188   :  { %416 = vst.msk [vmem:[%s717_s5] sm:$0xff] %vm415_vm7, %v413_v36  ;;  %417 = vst.msk [vmem:[%s717_s5 + $0x8] sm:$0xff] %vm415_vm7, %v414_v37 }
 0x18a   :  { %v391_v42 = vpop.xlane.xlu0 %390  ;;  %v394_v43 = vpop.xlane.xlu1 %393 }
 0x18b   :  { %v422_v44 = vsel %vm412_vm6, %v420_v40, %v391_v42  ;;  %v423_v45 = vsel %vm412_vm6, %v421_v41, %v394_v43 }
 0x18c   :  { %424 = vst.msk [vmem:[%s718_s6] sm:$0xff] %vm415_vm7, %v422_v44  ;;  %425 = vst.msk [vmem:[%s718_s6 + $0x8] sm:$0xff] %vm415_vm7, %v423_v45 }

</bundles_post_ra>
